<compile_context>
chip_gen: v6e
topology: v6e:2x2x1
jax: 0.10.0
libtpu: 0.0.40
codegen_flags: <defaults>
</compile_context>

<pallas_src>
import functools
import math

import jax
import jax.numpy as jnp
from jax.experimental import pallas as pl
from jax.experimental.pallas import tpu as pltpu


def _round_up(x, m):
    return ((x + m - 1) // m) * m


def sage_mean_kernel(adj_ref, feat_src_ref, feat_dst_ref, w_ref, b_ref,
                     out_ref, acc_ref, *, f_in, f_agg):
    k = pl.program_id(1)

    @pl.when(k == 0)
    def _init():
        acc_ref[...] = jnp.zeros_like(acc_ref)

    # --- neighbor feature-sum accumulation over source-node (K) tiles ---
    # adj and feat_src are bf16 (adj values 0/1 are exact); the MXU accumulates in f32.
    # Column `f_in` of feat_src is all-ones, so acc[:, f_in] accumulates the in-degree.
    acc_ref[...] += jnp.dot(adj_ref[...], feat_src_ref[...],
                            preferred_element_type=jnp.float32)

    # --- finalize: mean, self+neigh projections on the stacked weight, bias ---
    @pl.when(k == pl.num_programs(1) - 1)
    def _finalize():
        acc = acc_ref[...]                              # (tm, f_agg) f32
        deg = acc[:, f_in:f_in + 1]                     # in-degree (folded into matmul)
        inv = 1.0 / jnp.maximum(deg, 1.0)               # exact divide (zero-deg -> 0 mean)
        h_neigh = acc * inv                             # degree col scaled too; its W row is 0
        # Stacked, pre-transposed weights (static ref slices are zero-cost views):
        #   rows [0 : f_agg)        = W_self.T  (zero-padded)
        #   rows [f_agg : 2*f_agg)  = W_neigh.T (zero-padded; degree-column row is 0)
        out = jnp.dot(feat_dst_ref[...], w_ref[:f_agg, :],
                      preferred_element_type=jnp.float32)
        out += jnp.dot(h_neigh, w_ref[f_agg:, :],
                       preferred_element_type=jnp.float32)
        out_ref[...] = (out + b_ref[...]).astype(out_ref.dtype)


def sage_conv_mean(adj, feat, w_self, b_self, w_neigh, b_neigh, *, tm=256, tk=1024):
    """Pallas SAGEConv forward (mean aggregator).

    adj:     (N, N) 0/1 adjacency, adj[d, s] = 1 iff edge s -> d (must be unweighted:
             it is streamed as bf16, which is only exact for 0/1 values)
    feat:    (N, F_in)
    w_self:  (F_out, F_in), b_self: (F_out,)
    w_neigh: (F_out, F_in), b_neigh: (F_out,)
    tm / tk: destination-row / source-column tile sizes (tk multiple of 128).
    """
    N, f_in = feat.shape
    f_out = w_self.shape[0]

    # ---------- wrapper-side layout prep (free XLA plumbing) ----------
    f_agg = _round_up(f_in + 1, 8)       # +1 lane carries the in-degree (ones column)
    f_out_p = _round_up(f_out, 128)      # lane-dense output -> unmasked vector stores

    w_self_t = jnp.pad(w_self.T.astype(jnp.float32),
                       ((0, f_agg - f_in), (0, f_out_p - f_out)))
    w_neigh_t = jnp.pad(w_neigh.T.astype(jnp.float32),
                        ((0, f_agg - f_in), (0, f_out_p - f_out)))
    w_cat = jnp.concatenate([w_self_t, w_neigh_t], axis=0)        # (2*f_agg, F_out_p)
    b_tot = jnp.pad((b_self + b_neigh).reshape(1, f_out).astype(jnp.float32),
                    ((0, 0), (0, f_out_p - f_out)))                # (1, F_out_p)

    # Tile sizes + node-axis padding (tm multiple of 16 for bf16 sublane packing,
    # tk multiple of 128 lanes).
    tm = int(min(tm, _round_up(N, 16)))
    tk = int(min(tk, _round_up(N, 128)))
    n_m = pl.cdiv(N, tm)
    n_k = pl.cdiv(N, tk)
    Nm, Nk = n_m * tm, n_k * tk

    # Adjacency as bf16 (exact for 0/1).  For reused graphs this cast/pad should be
    # hoisted/cached by the caller; here it fuses under jit with the rest of the prep.
    adj_p = jnp.pad(adj.astype(jnp.bfloat16), ((0, Nm - N), (0, Nk - N)))

    # Source features in bf16 with an appended ones column (degree accumulator);
    # padded rows/cols are zero so they contribute nothing.
    feat_src_aug = jnp.concatenate([feat, jnp.ones((N, 1), feat.dtype)], axis=1)
    feat_src_p = jnp.pad(feat_src_aug.astype(jnp.bfloat16),
                         ((0, Nk - N), (0, f_agg - (f_in + 1))))
    # Destination features stay f32 (fetched once per dst tile, not re-streamed).
    feat_dst_p = jnp.pad(feat.astype(jnp.float32),
                         ((0, Nm - N), (0, f_agg - f_in)))

    kernel = functools.partial(sage_mean_kernel, f_in=f_in, f_agg=f_agg)

    out_p = pl.pallas_call(
        kernel,
        out_shape=jax.ShapeDtypeStruct((Nm, f_out_p), jnp.float32),
        grid_spec=pltpu.PrefetchScalarGridSpec(
            num_scalar_prefetch=0,
            grid=(n_m, n_k),
            in_specs=[
                pl.BlockSpec((tm, tk), lambda i, k: (i, k)),             # adj tile (bf16)
                pl.BlockSpec((tk, f_agg), lambda i, k: (k, 0)),          # feat_src (+ones)
                pl.BlockSpec((tm, f_agg), lambda i, k: (i, 0)),          # feat_dst (f32)
                pl.BlockSpec((2 * f_agg, f_out_p), lambda i, k: (0, 0)), # stacked W^T
                pl.BlockSpec((1, f_out_p), lambda i, k: (0, 0)),         # combined bias
            ],
            out_specs=pl.BlockSpec((tm, f_out_p), lambda i, k: (i, 0)),
            scratch_shapes=[pltpu.VMEM((tm, f_agg), jnp.float32)],       # neighbor-sum acc
        ),
        compiler_params=pltpu.CompilerParams(
            dimension_semantics=("parallel", "arbitrary"),
            vmem_limit_bytes=64 * 1024 * 1024,
        ),
    )(adj_p, feat_src_p, feat_dst_p, w_cat, b_tot)

    return out_p[:N, :f_out]


def xavier_uniform(key, shape, gain):
    fan_out, fan_in = shape
    bound = gain * math.sqrt(6.0 / (fan_in + fan_out))
    return jax.random.uniform(key, shape, jnp.float32, -bound, bound)


def reference(adj, feat, w_self, b_self, w_neigh, b_neigh):
    deg = adj.sum(axis=-1, keepdims=True)
    h_neigh = (adj @ feat) / jnp.maximum(deg, 1.0)
    return feat @ w_self.T + b_self + h_neigh @ w_neigh.T + b_neigh


if __name__ == "__main__":
    key = jax.random.PRNGKey(0)
    k_adj, k_feat, k_ws, k_bs, k_wn, k_bn = jax.random.split(key, 6)

    N = 300          # not tile-aligned: exercises padding + a 3x3 tiled grid below
    in_feats = 32
    out_feats = 64

    # random directed graph (dense 0/1 adjacency, row d = in-neighbors of dst node d)
    adj = (jax.random.uniform(k_adj, (N, N)) < 0.1).astype(jnp.float32)
    feat = jax.random.normal(k_feat, (N, in_feats), jnp.float32)

    gain = math.sqrt(2.0)  # nn.init.calculate_gain('relu')
    w_self = xavier_uniform(k_ws, (out_feats, in_feats), gain)
    w_neigh = xavier_uniform(k_wn, (out_feats, in_feats), gain)
    bias_bound = 1.0 / math.sqrt(in_feats)  # PyTorch nn.Linear default bias init
    b_self = jax.random.uniform(k_bs, (out_feats,), jnp.float32, -bias_bound, bias_bound)
    b_neigh = jax.random.uniform(k_bn, (out_feats,), jnp.float32, -bias_bound, bias_bound)

    ref = reference(adj, feat, w_self, b_self, w_neigh, b_neigh)

    # Small tiles (multi-step reduction + padded edges) and the default large-tile config.
    fn_small = jax.jit(lambda a, x, ws, bs, wn, bn:
                       sage_conv_mean(a, x, ws, bs, wn, bn, tm=128, tk=128))
    fn_default = jax.jit(lambda a, x, ws, bs, wn, bn:
                         sage_conv_mean(a, x, ws, bs, wn, bn))

    for fn in (fn_small, fn_default):
        out = fn(adj, feat, w_self, b_self, w_neigh, b_neigh)
        out = jax.block_until_ready(out)
        assert out.shape == (N, out_feats)
        err = float(jnp.max(jnp.abs(out - ref)))
        # bf16 source features with f32 accumulation -> ~1e-3-level relative error.
        assert jnp.allclose(out, ref, atol=1e-2, rtol=1e-2), err

    print("KERNEL_OK")
</pallas_src>

<mosaic_0001>
module attributes {stable_mosaic.version = 11 : i64} {
  func.func @sage_mean_kernel(%arg0: i32, %arg1: i32, %arg2: memref<128x128xbf16, #tpu.memory_space<vmem>>, %arg3: memref<128x40xbf16, #tpu.memory_space<vmem>>, %arg4: memref<128x40xf32, #tpu.memory_space<vmem>>, %arg5: memref<80x128xf32, #tpu.memory_space<vmem>>, %arg6: memref<1x128xf32, #tpu.memory_space<vmem>>, %arg7: memref<128x128xf32, #tpu.memory_space<vmem>>, %arg8: memref<128x40xf32, #tpu.memory_space<vmem>>) attributes {dimension_semantics = [#tpu.dimension_semantics<parallel>, #tpu.dimension_semantics<arbitrary>], iteration_bounds = array<i64: 3, 3>, scalar_prefetch = 0 : i64, scratch_operands = 1 : i64, tpu.core_type = #tpu.core_type<tc>, window_params = [{transform_indices = @transform_0, window_bounds = array<i64: 128, 128>}, {transform_indices = @transform_1, window_bounds = array<i64: 128, 40>}, {transform_indices = @transform_2, window_bounds = array<i64: 128, 40>}, {pipeline_mode = #tpu.pipeline_mode<synchronous>, transform_indices = @transform_3, window_bounds = array<i64: 80, 128>}, {pipeline_mode = #tpu.pipeline_mode<synchronous>, transform_indices = @transform_4, window_bounds = array<i64: 1, 128>}, {transform_indices = @transform_5, window_bounds = array<i64: 128, 128>}]} {
    %c0_i32 = arith.constant 0 : i32
    %0 = arith.cmpi eq, %arg1, %c0_i32 : i32
    %1 = arith.extui %0 : i1 to i32
    %c0_i32_0 = arith.constant 0 : i32
    %2 = arith.cmpi ne, %1, %c0_i32_0 : i32
    scf.if %2 {
      %cst_9 = arith.constant 0.000000e+00 : f32
      %12 = vector.broadcast %cst_9 : f32 to vector<128x40xf32>
      %c0_10 = arith.constant 0 : index
      %c0_11 = arith.constant 0 : index
      %13 = vector.load %arg8[%c0_10, %c0_11] : memref<128x40xf32, #tpu.memory_space<vmem>>, vector<128x40xf32>
      tpu.vector_store %arg8[%c0_10, %c0_11], %12 {strides = array<i32>} : memref<128x40xf32, #tpu.memory_space<vmem>>, vector<128x40xf32>,
    } else {
    }
    %c0 = arith.constant 0 : index
    %c0_1 = arith.constant 0 : index
    %3 = vector.load %arg8[%c0, %c0_1] : memref<128x40xf32, #tpu.memory_space<vmem>>, vector<128x40xf32>
    %c0_2 = arith.constant 0 : index
    %c0_3 = arith.constant 0 : index
    %4 = vector.load %arg2[%c0_2, %c0_3] : memref<128x128xbf16, #tpu.memory_space<vmem>>, vector<128x128xbf16>
    %c0_4 = arith.constant 0 : index
    %c0_5 = arith.constant 0 : index
    %5 = vector.load %arg3[%c0_4, %c0_5] : memref<128x40xbf16, #tpu.memory_space<vmem>>, vector<128x40xbf16>
    %cst = arith.constant dense<0.000000e+00> : vector<128x40xf32>
    %6 = tpu.matmul %4, %5, %cst {dimension_numbers = #tpu.dot_dimension_numbers<[1], [0], [0], [1], [0, 0, 1, 1], [], []>} : vector<128x128xbf16>, vector<128x40xbf16>, vector<128x40xf32> -> vector<128x40xf32>
    %7 = arith.addf %3, %6 : vector<128x40xf32>
    %c0_6 = arith.constant 0 : index
    %c0_7 = arith.constant 0 : index
    %8 = vector.load %arg8[%c0_6, %c0_7] : memref<128x40xf32, #tpu.memory_space<vmem>>, vector<128x40xf32>
    tpu.vector_store %arg8[%c0_6, %c0_7], %7 {strides = array<i32>} : memref<128x40xf32, #tpu.memory_space<vmem>>, vector<128x40xf32>,
    %c2_i32 = arith.constant 2 : i32
    %9 = arith.cmpi eq, %arg1, %c2_i32 : i32
    %10 = arith.extui %9 : i1 to i32
    %c0_i32_8 = arith.constant 0 : i32
    %11 = arith.cmpi ne, %10, %c0_i32_8 : i32
    scf.if %11 {
      %c0_9 = arith.constant 0 : index
      %c0_10 = arith.constant 0 : index
      %12 = vector.load %arg8[%c0_9, %c0_10] : memref<128x40xf32, #tpu.memory_space<vmem>>, vector<128x40xf32>
      %13 = vector.extract_strided_slice %12 {offsets = [0, 32], sizes = [128, 1], strides = [1, 1]} : vector<128x40xf32> to vector<128x1xf32>
      %cst_11 = arith.constant 1.000000e+00 : f32
      %14 = vector.broadcast %cst_11 : f32 to vector<128x1xf32>
      %15 = arith.maximumf %13, %14 : vector<128x1xf32>
      %cst_12 = arith.constant 1.000000e+00 : f32
      %16 = vector.broadcast %cst_12 : f32 to vector<128x1xf32>
      %17 = arith.divf %16, %15 : vector<128x1xf32>
      %18 = vector.broadcast %17 : vector<128x1xf32> to vector<128x40xf32>
      %19 = arith.mulf %12, %18 : vector<128x40xf32>
      %c0_13 = arith.constant 0 : index
      %c0_14 = arith.constant 0 : index
      %20 = vector.load %arg4[%c0_13, %c0_14] : memref<128x40xf32, #tpu.memory_space<vmem>>, vector<128x40xf32>
      %c0_15 = arith.constant 0 : index
      %c0_16 = arith.constant 0 : index
      %21 = vector.load %arg5[%c0_15, %c0_16] : memref<80x128xf32, #tpu.memory_space<vmem>>, vector<40x128xf32>
      %cst_17 = arith.constant dense<0.000000e+00> : vector<128x128xf32>
      %22 = tpu.matmul %20, %21, %cst_17 {dimension_numbers = #tpu.dot_dimension_numbers<[1], [0], [0], [1], [0, 0, 1, 1], [], []>} : vector<128x40xf32>, vector<40x128xf32>, vector<128x128xf32> -> vector<128x128xf32>
      %c40 = arith.constant 40 : index
      %c0_18 = arith.constant 0 : index
      %23 = vector.load %arg5[%c40, %c0_18] : memref<80x128xf32, #tpu.memory_space<vmem>>, vector<40x128xf32>
      %cst_19 = arith.constant dense<0.000000e+00> : vector<128x128xf32>
      %24 = tpu.matmul %19, %23, %cst_19 {dimension_numbers = #tpu.dot_dimension_numbers<[1], [0], [0], [1], [0, 0, 1, 1], [], []>} : vector<128x40xf32>, vector<40x128xf32>, vector<128x128xf32> -> vector<128x128xf32>
      %25 = arith.addf %22, %24 : vector<128x128xf32>
      %c0_20 = arith.constant 0 : index
      %c0_21 = arith.constant 0 : index
      %26 = vector.load %arg6[%c0_20, %c0_21] : memref<1x128xf32, #tpu.memory_space<vmem>>, vector<1x128xf32>
      %27 = vector.broadcast %26 : vector<1x128xf32> to vector<128x128xf32>
      %28 = arith.addf %25, %27 : vector<128x128xf32>
      %c0_22 = arith.constant 0 : index
      %c0_23 = arith.constant 0 : index
      %29 = vector.load %arg7[%c0_22, %c0_23] : memref<128x128xf32, #tpu.memory_space<vmem>>, vector<128x128xf32>
      tpu.vector_store %arg7[%c0_22, %c0_23], %28 {strides = array<i32>} : memref<128x128xf32, #tpu.memory_space<vmem>>, vector<128x128xf32>,
    } else {
    }
    return
  }
  func.func @transform_0(%arg0: i32, %arg1: i32) -> (i32, i32) {
    %c0_i32 = arith.constant 0 : i32
    return %arg0, %arg1 : i32, i32
  }
  func.func @transform_1(%arg0: i32, %arg1: i32) -> (i32, i32) {
    %c0_i32 = arith.constant 0 : i32
    %c0_i32_0 = arith.constant 0 : i32
    return %arg1, %c0_i32 : i32, i32
  }
  func.func @transform_2(%arg0: i32, %arg1: i32) -> (i32, i32) {
    %c0_i32 = arith.constant 0 : i32
    %c0_i32_0 = arith.constant 0 : i32
    return %arg0, %c0_i32 : i32, i32
  }
  func.func @transform_3(%arg0: i32, %arg1: i32) -> (i32, i32) {
    %c0_i32 = arith.constant 0 : i32
    %c0_i32_0 = arith.constant 0 : i32
    %c0_i32_1 = arith.constant 0 : i32
    return %c0_i32, %c0_i32_0 : i32, i32
  }
  func.func @transform_4(%arg0: i32, %arg1: i32) -> (i32, i32) {
    %c0_i32 = arith.constant 0 : i32
    %c0_i32_0 = arith.constant 0 : i32
    %c0_i32_1 = arith.constant 0 : i32
    return %c0_i32, %c0_i32_0 : i32, i32
  }
  func.func @transform_5(%arg0: i32, %arg1: i32) -> (i32, i32) {
    %c0_i32 = arith.constant 0 : i32
    %c0_i32_0 = arith.constant 0 : i32
    return %arg0, %c0_i32 : i32, i32
  }
}

</mosaic_0001>

<bundles_post_ra>
// kernel: _lambda_.1
= control target key start
LH: loop header
LB: loop body
LE: loop exit
PB: predicated region body
PF: predicated region fallthrough
CT: control target
= control target key end

     0   :  { %s1842_s18 = smov 0   ;;  %s1844_s19 = smov 0   ;;  %s2192_s0 = inlined_call_operand.vmem [shape: bf16[384,384], index: 0, kind: input, shape index: {}]   ;;  %s2193_s1 = inlined_call_operand.vmem [shape: bf16[384,40], index: 1, kind: input, shape index: {}]   ;;  %s2194_s2 = inlined_call_operand.vmem [shape: f32[384,40], index: 2, kind: input, shape index: {}]   ;;  %s2195_s3 = inlined_call_operand.vmem [shape: f32[80,128], index: 3, kind: input, shape index: {}]   ;;  %s2196_s4 = inlined_call_operand.vmem [shape: f32[1,128], index: 4, kind: input, shape index: {}]   ;;  %s2197_s5 = inlined_call_operand.vmem [shape: f32[384,128], index: 5, kind: output, shape index: {}]  }
   0x1   :  { %s1846_s20 = smov 0   ;;  %s1848_s21 = smov 0  }
   0x2   :  { %s1850_s22 = smov 0   ;;  %s1852_s23 = smov 0  }
   0x3   :  { %s1854_s24 = smov 0  }
   0x4 LB: > { %s24_s25 = sadd.s32 1, %s1800_s22  ;;  %s27_s26 = sadd.s32 1, %s1804_s23  ;;  %s1808_s24 = sphi %s1854_s24, %s15_s24   ;;  %s1804_s23 = sphi %s1852_s23, %s2203_s23   ;;  %s1800_s22 = sphi %s1850_s22, %s2202_s22   ;;  %s1796_s21 = sphi %s1848_s21, %s2201_s21   ;;  %s1792_s20 = sphi %s1846_s20, %s2200_s20   ;;  %s1788_s19 = sphi %s1844_s19, %s2199_s19   ;;  %s1784_s18 = sphi %s1842_s18, %s2198_s18  }
   0x5   : > { %p25_p0 = scmp.ge.s32.totalorder %s24_s25, 3  ;;  %p43_p1 = scmp.ne.s32.totalorder %s1788_s19, %s1784_s18 }
   0x6   : > { %p44_p2 = scmp.eq.s32.totalorder %s1808_s24, 0  ;;  %s36_s30 = sadd.s32 1, %s1788_s19 }
   0x7   : > { %s2205_s25 = smov (%p25_p0, %s24_s25), 0  ;;  %s2207_s26 = smov (!%p25_p0, %s27_s26), %s1804_s23 }
   0x8   : > { %p45_p3 = por %p44_p2, %p43_p1  ;;  %p29_p4 = scmp.ge.s32.totalorder %s2207_s26, 3 }
   0x9   : > { %s32_s27 = ssub.s32 %s1800_s22, %s2205_s25  ;;  %p1405_p6 = scmp.ge.s32.totalorder %s1808_s24, 9 }
   0xa   : > { %s2209_s26 = smov (%p29_p4, %s2207_s26), 0 }
   0xb   : > { %s31_s28 = ssub.s32 %s1804_s23, %s2209_s26  ;;  %195 = sbr.rel (%p1405_p6) target bundleno = 33 (0x21), region = 24 }
   0xc   : > { %s33_s29 = sor.u32 %s32_s27, %s31_s28 }
   0xd   : > { %p34_p5 = scmp.eq.s32.totalorder %s33_s29, 0 }
   0xf   : > { %s1893_s6 = scalar_select %p34_p5, %s1788_s19, %s36_s30  }
  0x10   : > { %198 = sbr.rel (!%p45_p3) target bundleno = 33 (0x21), region = 28  ;;  %s200_s7 = sand.u32 (%p45_p3), 1, %s1788_s19  }
  0x11   : > { %s1645_s8 = smul.u32 (%p45_p3), 48, %s1804_s23  ;;  %s1406_s9 = sshll.u32 (%p45_p3), %s200_s7, 6 }
  0x12   : > { %s202_s15 = scalar_lea.vmem (%p45_p3), [#allocation3], %s1406_s9 }
  0x13   : > { %s205_s10 = sadd.s32 (%p45_p3), %s1800_s22, %s1645_s8 }
  0x14   : > { %s1409_s11 = sshll.u32 (%p45_p3), %s205_s10, 2 }
  0x15   : > { %s1902_s14 = scalar_lea.vmem %s2192_s0, %s1409_s11 }
  0x16   : > { %v224_v0 = vld [vmem:[%s1902_s14] sm:$0xf]  ;;  %v226_v1 = vld [vmem:[%s1902_s14 + $0xc] sm:$0xf]  ;;  %v228_v2 = vld [vmem:[%s1902_s14 + $0x18] sm:$0xf] }
  0x17   : > { %225 = vst [vmem:[%s202_s15] sm:$0xf] %v224_v0  ;;  %227 = vst [vmem:[%s202_s15 + $0x4] sm:$0xf] %v226_v1  ;;  %v230_v3 = vld [vmem:[%s1902_s14 + $0x24] sm:$0xf] }
  0x18   : > { %229 = vst [vmem:[%s202_s15 + $0x8] sm:$0xf] %v228_v2  ;;  %v232_v4 = vld [vmem:[%s1902_s14 + $0x30] sm:$0xf]  ;;  %v234_v5 = vld [vmem:[%s1902_s14 + $0x3c] sm:$0xf] }
  0x19   : > { %231 = vst [vmem:[%s202_s15 + $0xc] sm:$0xf] %v230_v3  ;;  %233 = vst [vmem:[%s202_s15 + $0x10] sm:$0xf] %v232_v4  ;;  %v236_v6 = vld [vmem:[%s1902_s14 + $0x48] sm:$0xf] }
  0x1a   : > { %235 = vst [vmem:[%s202_s15 + $0x14] sm:$0xf] %v234_v5  ;;  %v238_v7 = vld [vmem:[%s1902_s14 + $0x54] sm:$0xf]  ;;  %v240_v8 = vld [vmem:[%s1902_s14 + $0x60] sm:$0xf] }
  0x1b   : > { %237 = vst [vmem:[%s202_s15 + $0x18] sm:$0xf] %v236_v6  ;;  %239 = vst [vmem:[%s202_s15 + $0x1c] sm:$0xf] %v238_v7  ;;  %v242_v9 = vld [vmem:[%s1902_s14 + $0x6c] sm:$0xf] }
  0x1c   : > { %241 = vst [vmem:[%s202_s15 + $0x20] sm:$0xf] %v240_v8  ;;  %v244_v10 = vld [vmem:[%s1902_s14 + $0x78] sm:$0xf]  ;;  %v246_v11 = vld [vmem:[%s1902_s14 + $0x84] sm:$0xf] }
  0x1d   : > { %243 = vst [vmem:[%s202_s15 + $0x24] sm:$0xf] %v242_v9  ;;  %245 = vst [vmem:[%s202_s15 + $0x28] sm:$0xf] %v244_v10  ;;  %v248_v12 = vld [vmem:[%s1902_s14 + $0x90] sm:$0xf] }
  0x1e   : > { %247 = vst [vmem:[%s202_s15 + $0x2c] sm:$0xf] %v246_v11  ;;  %v250_v13 = vld [vmem:[%s1902_s14 + $0x9c] sm:$0xf]  ;;  %v252_v14 = vld [vmem:[%s1902_s14 + $0xa8] sm:$0xf] }
  0x1f   : > { %249 = vst [vmem:[%s202_s15 + $0x30] sm:$0xf] %v248_v12  ;;  %251 = vst [vmem:[%s202_s15 + $0x34] sm:$0xf] %v250_v13  ;;  %v254_v15 = vld [vmem:[%s1902_s14 + $0xb4] sm:$0xf] }
  0x20   : > { %253 = vst [vmem:[%s202_s15 + $0x38] sm:$0xf] %v252_v14  ;;  %255 = vst [vmem:[%s202_s15 + $0x3c] sm:$0xf] %v254_v15 }
  0x21 PF: > { %p1410_p7 = scmp.ge.s32.totalorder %s1808_s24, 1  ;;  %p328_p8 = scmp.lt.s32.totalorder %s1808_s24, 10 }
  0x23   : > { %p329_p9 = pnand %p1410_p7, %p328_p8 }
  0x24   : > { %s335_s16 = sand.u32 (!%p329_p9), 1, %s1784_s18   ;;  %s1412_s17 = sshll.u32 (!%p329_p9), %s1792_s20, 4 }
  0x25   : > { %332 = sbr.rel (%p329_p9) target bundleno = 678 (0x2a6), region = 77  ;;  %s1411_s27 = sshll.u32 (!%p329_p9), %s335_s16, 6 }
  0x26   : > { %p374_p10 = scmp.lt.s32.totalorder (!%p329_p9), %s1412_s17, 47  ;;  %s1414_s28 = sshll.u32 (!%p329_p9), %s1796_s21, 4 }
  0x27   : > { %p380_p11 = scmp.lt.s32.totalorder (!%p329_p9), %s1414_s28, 47  ;;  %s1940_s21 = scalar_lea.vmem (!%p329_p9), [#allocation3], %s1411_s27 }
  0x28   : > { %p1418_p12 = scmp.ne.s32.totalorder (!%p329_p9), %s1792_s20, 0 }
  0x2a   : > { %s2211_s17 = smov (!%p374_p10, %s1412_s17), 47  ;;  %s2213_s28 = smov (!%p380_p11, %s1414_s28), 47 }
  0x2b   : > { %s1413_s29 = sshll.u32 %s2211_s17, 2  ;;  %s1415_s9 = sshll.u32 %s2213_s28, 3 }
  0x2c   : > { %s1928_s8 = scalar_lea.vmem %s2193_s1, %s1413_s29  ;;  %s1933_s12 = scalar_lea.vmem %s2194_s2, %s1415_s9 }
  0x2d   : > { %s1938_s14 = scalar_lea.vmem %s2197_s5, %s1415_s9  ;;  %395 = sbr.rel (%p1418_p12) target bundleno = 59 (0x3b), region = 85 }
  0x32   : > { %vm396_vm0 = vcmask 326656   ;;  %v1810_v16 = vmov 0.0  }
  0x33   : > { %397 = vst.msk [vmem:[#allocation2] sm:$0xff] %vm396_vm0, %v1810_v16  ;;  %398 = vst.msk [vmem:[#allocation2 + $0x8] sm:$0xff] %vm396_vm0, %v1810_v16 }
  0x34   : > { %399 = vst.msk [vmem:[#allocation2 + $0x10] sm:$0xff] %vm396_vm0, %v1810_v16  ;;  %400 = vst.msk [vmem:[#allocation2 + $0x18] sm:$0xff] %vm396_vm0, %v1810_v16 }
  0x35   : > { %401 = vst.msk [vmem:[#allocation2 + $0x20] sm:$0xff] %vm396_vm0, %v1810_v16  ;;  %402 = vst.msk [vmem:[#allocation2 + $0x28] sm:$0xff] %vm396_vm0, %v1810_v16 }
  0x36   : > { %403 = vst.msk [vmem:[#allocation2 + $0x30] sm:$0xff] %vm396_vm0, %v1810_v16  ;;  %404 = vst.msk [vmem:[#allocation2 + $0x38] sm:$0xff] %vm396_vm0, %v1810_v16 }
  0x37   : > { %405 = vst.msk [vmem:[#allocation2 + $0x40] sm:$0xff] %vm396_vm0, %v1810_v16  ;;  %406 = vst.msk [vmem:[#allocation2 + $0x48] sm:$0xff] %vm396_vm0, %v1810_v16 }
  0x38   : > { %407 = vst.msk [vmem:[#allocation2 + $0x50] sm:$0xff] %vm396_vm0, %v1810_v16  ;;  %408 = vst.msk [vmem:[#allocation2 + $0x58] sm:$0xff] %vm396_vm0, %v1810_v16 }
  0x39   : > { %409 = vst.msk [vmem:[#allocation2 + $0x60] sm:$0xff] %vm396_vm0, %v1810_v16  ;;  %410 = vst.msk [vmem:[#allocation2 + $0x68] sm:$0xff] %vm396_vm0, %v1810_v16 }
  0x3a   : > { %411 = vst.msk [vmem:[#allocation2 + $0x70] sm:$0xff] %vm396_vm0, %v1810_v16  ;;  %412 = vst.msk [vmem:[#allocation2 + $0x78] sm:$0xff] %vm396_vm0, %v1810_v16 }
  0x3b PF: > { %v1704_v17 = vld [vmem:[%s1928_s8 + $0x38] sm:$0xff]   ;;  %v1705_v18 = vld [vmem:[%s1928_s8 + $0x30] sm:$0xff]   ;;  %v1706_v19 = vld [vmem:[%s1928_s8 + $0x28] sm:$0xff]   ;;  %vm670_vm1 = vcmask 326656   ;;  %p1435_p13 = scmp.ne.s32.totalorder %s1792_s20, 2 }
  0x3c   : > { %1529 = vmatprep.subr.bf16.mxu0 %v1704_v17  ;;  %1629 = vmatprep.subr.bf16.mxu1 %v1704_v17  ;;  %v1707_v20 = vld [vmem:[%s1928_s8 + $0x20] sm:$0xff]   ;;  %v1708_v23 = vld [vmem:[%s1928_s8 + $0x18] sm:$0xff]   ;;  %v1709_v24 = vld [vmem:[%s1928_s8 + $0x10] sm:$0xff]  }
  0x3d   : > { %1530 = vmatpush3.bf16.msra.mxu0 %v1704_v17  ;;  %1637 = vmatpush3.bf16.msra.mxu1 %v1704_v17  ;;  %v1712_v21 = vld [vmem:[%s1940_s21] sm:$0xff]   ;;  %v1710_v25 = vld [vmem:[%s1928_s8 + $0x8] sm:$0xff]   ;;  %v1716_v29 = vld [vmem:[%s1940_s21 + $0x10] sm:$0xff]  }
  0x3e   : > { %1531 = vmatprep.subr.bf16.mxu0 %v1705_v18  ;;  %1630 = vmatprep.subr.bf16.mxu1 %v1705_v18  ;;  %v1713_v22 = vld [vmem:[%s1940_s21 + $0x20] sm:$0xff]   ;;  %v1714_v27 = vld [vmem:[%s1940_s21 + $0x8] sm:$0xff]   ;;  %v1717_v30 = vld [vmem:[%s1940_s21 + $0x30] sm:$0xff]  }
  0x3f   : > { %1545 = vmatprep.mubr.bf16.mxu0 %v1712_v21  ;;  %1553 = vmatprep.mubr.bf16.mxu1 %v1713_v22  ;;  %v1711_v26 = vld [vmem:[%s1928_s8] sm:$0xff]   ;;  %v1715_v28 = vld [vmem:[%s1940_s21 + $0x28] sm:$0xff]   ;;  %v1718_v31 = vld [vmem:[%s1940_s21 + $0x18] sm:$0xff]  }
  0x40   : > { %v1719_v32 = vld [vmem:[%s1940_s21 + $0x38] sm:$0xff]   ;;  %v415_v33 = vld [vmem:[#allocation2 + $0x10] sm:$0xff]  ;;  %v413_v37 = vld [vmem:[#allocation2] sm:$0xff] }
  0x41   : > { %1532 = vmatpush3.bf16.msra.mxu0 %v1705_v18  ;;  %1638 = vmatpush3.bf16.msra.mxu1 %v1705_v18  ;;  %v423_v34 = vld [vmem:[#allocation2 + $0x50] sm:$0xff]  ;;  %v421_v38 = vld [vmem:[#allocation2 + $0x40] sm:$0xff]  ;;  %v416_v43 = vld [vmem:[#allocation2 + $0x18] sm:$0xff] }
  0x42   : > { %1533 = vmatprep.subr.bf16.mxu0 %v1706_v19  ;;  %1631 = vmatprep.subr.bf16.mxu1 %v1706_v19  ;;  %v424_v44 = vld [vmem:[#allocation2 + $0x58] sm:$0xff]  ;;  %v414_v49 = vld [vmem:[#allocation2 + $0x8] sm:$0xff]  ;;  %v419_v55 = vld [vmem:[#allocation2 + $0x30] sm:$0xff] }
  0x43   : > { %v422_v50 = vld [vmem:[#allocation2 + $0x48] sm:$0xff]  ;;  %v427_v56 = vld [vmem:[#allocation2 + $0x70] sm:$0xff]  ;;  %v417_v61 = vld [vmem:[#allocation2 + $0x20] sm:$0xff] }
  0x44   : > { %v425_v62 = vld [vmem:[#allocation2 + $0x60] sm:$0xff]  ;;  %v420_v3 = vld [vmem:[#allocation2 + $0x38] sm:$0xff]  ;;  %v418_v9 = vld [vmem:[#allocation2 + $0x28] sm:$0xff] }
  0x45   : > { %1534 = vmatpush3.bf16.msra.mxu0 %v1706_v19  ;;  %1639 = vmatpush3.bf16.msra.mxu1 %v1706_v19  ;;  %v428_v4 = vld [vmem:[#allocation2 + $0x78] sm:$0xff]  ;;  %v426_v10 = vld [vmem:[#allocation2 + $0x68] sm:$0xff] }
  0x46   : > { %1535 = vmatprep.subr.bf16.mxu0 %v1707_v20  ;;  %1632 = vmatprep.subr.bf16.mxu1 %v1707_v20 }
  0x49   : > { %1536 = vmatpush3.bf16.msra.mxu0 %v1707_v20  ;;  %1640 = vmatpush3.bf16.msra.mxu1 %v1707_v20 }
  0x4a   : > { %1537 = vmatprep.subr.bf16.mxu0 %v1708_v23  ;;  %1633 = vmatprep.subr.bf16.mxu1 %v1708_v23 }
  0x4d   : > { %1538 = vmatpush3.bf16.msra.mxu0 %v1708_v23  ;;  %1641 = vmatpush3.bf16.msra.mxu1 %v1708_v23 }
  0x4e   : > { %1539 = vmatprep.subr.bf16.mxu0 %v1709_v24  ;;  %1634 = vmatprep.subr.bf16.mxu1 %v1709_v24 }
  0x51   : > { %1540 = vmatpush3.bf16.msra.mxu0 %v1709_v24  ;;  %1642 = vmatpush3.bf16.msra.mxu1 %v1709_v24 }
  0x52   : > { %1541 = vmatprep.subr.bf16.mxu0 %v1710_v25  ;;  %1635 = vmatprep.subr.bf16.mxu1 %v1710_v25 }
  0x55   : > { %1542 = vmatpush3.bf16.msra.mxu0 %v1710_v25  ;;  %1643 = vmatpush3.bf16.msra.mxu1 %v1710_v25 }
  0x56   : > { %1543 = vmatprep.subr.bf16.mxu0 %v1711_v26  ;;  %1636 = vmatprep.subr.bf16.mxu1 %v1711_v26 }
  0x59   : > { %1544 = vmatpush3.bf16.msra.mxu0 %v1711_v26  ;;  %1644 = vmatpush3.bf16.msra.mxu1 %v1711_v26 }
  0x5c   : > { %1546 = vmatmul.mubr.bf16.vlgmr.msra.gmra.mxu0 %v1714_v27  ;;  %1554 = vmatmul.mubr.bf16.vlgmr.msra.gmra.mxu1 %v1715_v28 }
  0x5d   : > { %1549 = vmatprep.mubr.bf16.mxu0 %v1716_v29  ;;  %1557 = vmatprep.mubr.bf16.mxu1 %v1717_v30 }
  0x64   : > { %1550 = vmatmul.mubr.bf16.gmra.mxu0 %v1718_v31  ;;  %1558 = vmatmul.mubr.bf16.gmra.mxu1 %v1719_v32 }
 0x11c   : > { %v1547_v35 = vpop.f32.mrf.mxu0  ;;  %v1555_v36 = vpop.f32.mrf.mxu1 }
 0x11d   : > { %v656_v39 = vadd.f32 %v1547_v35, %v415_v33  ;;  %v664_v40 = vadd.f32 %v1555_v36, %v423_v34 }
 0x11e   : > { %v591_v41 = vpop.f32.mrf.mxu0  ;;  %v623_v42 = vpop.f32.mrf.mxu1 }
 0x11f   : > { %673 = vst.msk [vmem:[#allocation2 + $0x10] sm:$0xff] %vm670_vm1, %v656_v39  ;;  %681 = vst.msk [vmem:[#allocation2 + $0x50] sm:$0xff] %vm670_vm1, %v664_v40  ;;  %v654_v45 = vadd.f32 %v591_v41, %v413_v37  ;;  %v662_v46 = vadd.f32 %v623_v42, %v421_v38 }
 0x120   : > { %v1548_v47 = vpop.f32.mrf.mxu0  ;;  %v1556_v48 = vpop.f32.mrf.mxu1 }
 0x121   : > { %671 = vst.msk [vmem:[#allocation2] sm:$0xff] %vm670_vm1, %v654_v45  ;;  %679 = vst.msk [vmem:[#allocation2 + $0x40] sm:$0xff] %vm670_vm1, %v662_v46  ;;  %v657_v51 = vadd.f32 %v1548_v47, %v416_v43  ;;  %v665_v52 = vadd.f32 %v1556_v48, %v424_v44 }
 0x122   : > { %v594_v53 = vpop.f32.mrf.mxu0  ;;  %v626_v54 = vpop.f32.mrf.mxu1 }
 0x123   : > { %674 = vst.msk [vmem:[#allocation2 + $0x18] sm:$0xff] %vm670_vm1, %v657_v51  ;;  %682 = vst.msk [vmem:[#allocation2 + $0x58] sm:$0xff] %vm670_vm1, %v665_v52  ;;  %v655_v57 = vadd.f32 %v594_v53, %v414_v49  ;;  %v663_v58 = vadd.f32 %v626_v54, %v422_v50 }
 0x124   : > { %v1551_v59 = vpop.f32.mrf.mxu0  ;;  %v1559_v60 = vpop.f32.mrf.mxu1 }
 0x125   : > { %672 = vst.msk [vmem:[#allocation2 + $0x8] sm:$0xff] %vm670_vm1, %v655_v57  ;;  %680 = vst.msk [vmem:[#allocation2 + $0x48] sm:$0xff] %vm670_vm1, %v663_v58  ;;  %v660_v63 = vadd.f32 %v1551_v59, %v419_v55  ;;  %v668_v0 = vadd.f32 %v1559_v60, %v427_v56 }
 0x126   : > { %v607_v1 = vpop.f32.mrf.mxu0  ;;  %v639_v2 = vpop.f32.mrf.mxu1 }
 0x127   : > { %677 = vst.msk [vmem:[#allocation2 + $0x30] sm:$0xff] %vm670_vm1, %v660_v63  ;;  %685 = vst.msk [vmem:[#allocation2 + $0x70] sm:$0xff] %vm670_vm1, %v668_v0  ;;  %v658_v5 = vadd.f32 %v607_v1, %v417_v61  ;;  %v666_v6 = vadd.f32 %v639_v2, %v425_v62 }
 0x128   : > { %v1552_v7 = vpop.f32.mrf.mxu0  ;;  %v1560_v8 = vpop.f32.mrf.mxu1 }
 0x129   : > { %675 = vst.msk [vmem:[#allocation2 + $0x20] sm:$0xff] %vm670_vm1, %v658_v5  ;;  %683 = vst.msk [vmem:[#allocation2 + $0x60] sm:$0xff] %vm670_vm1, %v666_v6  ;;  %v661_v11 = vadd.f32 %v1552_v7, %v420_v3  ;;  %v669_v12 = vadd.f32 %v1560_v8, %v428_v4  ;;  %690 = sbr.rel (%p1435_p13) target bundleno = 678 (0x2a6), region = 89 }
 0x12a   : > { %v610_v13 = vpop.f32.mrf.mxu0  ;;  %v642_v14 = vpop.f32.mrf.mxu1 }
 0x12b   : > { %678 = vst.msk [vmem:[#allocation2 + $0x38] sm:$0xff] %vm670_vm1, %v661_v11  ;;  %686 = vst.msk [vmem:[#allocation2 + $0x78] sm:$0xff] %vm670_vm1, %v669_v12  ;;  %v659_v15 = vadd.f32 %v610_v13, %v418_v9  ;;  %v667_v16 = vadd.f32 %v642_v14, %v426_v10 }
 0x12d   : > { %676 = vst.msk [vmem:[#allocation2 + $0x28] sm:$0xff] %vm670_vm1, %v659_v15  ;;  %684 = vst.msk [vmem:[#allocation2 + $0x68] sm:$0xff] %vm670_vm1, %v667_v16 }
 0x12e   : > { %v1992_v17 = vld [vmem:[#allocation2 + $0x10] sm:$0xff]  ;;  %v1994_v18 = vld [vmem:[#allocation2] sm:$0xff]  ;;  %v1996_v19 = vld [vmem:[#allocation2 + $0x18] sm:$0xff]  ;;  %v1811_v20 = vmov 32  }
 0x12f   : > { %1721 = vset.pattern.permute.xlu1 %v1811_v20  ;;  %1720 = vset.pattern.permute.xlu0 %v1811_v20  ;;  %v709_v21 = vmax.f32 %v1992_v17, 1.0  ;;  %v707_v22 = vmax.f32 %v1994_v18, 1.0  ;;  %v710_v23 = vmax.f32 %v1996_v19, 1.0  ;;  %v2001_v24 = vld [vmem:[#allocation2 + $0x8] sm:$0xff]  ;;  %v871_v29 = vld [vmem:[%s2195_s3 + $0x20] sm:$0xff]  ;;  %v870_v33 = vld [vmem:[%s2195_s3 + $0x18] sm:$0xff] }
 0x130   : > { %v708_v25 = vmax.f32 %v2001_v24, 1.0  ;;  %v2006_v27 = vld [vmem:[#allocation2 + $0x20] sm:$0xff]  ;;  %v876_v30 = vld [vmem:[%s2195_s3 + $0x48] sm:$0xff]  ;;  %1595 = vmatprep.subr.mxu1 %v871_v29  ;;  %v2024_v35 = vld [vmem:[#allocation2 + $0x30] sm:$0xff] }
 0x131   : > { %1722 = vrcp.f32 %v709_v21  ;;  %v711_v31 = vmax.f32 %v2006_v27, 1.0  ;;  %1561 = vmatprep.subr.mxu0 %v876_v30  ;;  %v875_v34 = vld [vmem:[%s2195_s3 + $0x40] sm:$0xff]  ;;  %1596 = vmatpush3.msra.mxu1 %v871_v29  ;;  %v869_v36 = vld [vmem:[%s2195_s3 + $0x10] sm:$0xff]  ;;  %v713_v38 = vmax.f32 %v2024_v35, 1.0  ;;  %v2031_v39 = vld [vmem:[#allocation2 + $0x48] sm:$0xff] }
 0x132   : > { %1724 = vrcp.f32 %v707_v22  ;;  %v2016_v32 = vld [vmem:[#allocation2 + $0x38] sm:$0xff]  ;;  %1562 = vmatpush3.msra.mxu0 %v876_v30  ;;  %1597 = vmatprep.subr.mxu1 %v870_v33  ;;  %v2033_v40 = vld [vmem:[#allocation2 + $0x40] sm:$0xff]  ;;  %v716_v41 = vmax.f32 %v2031_v39, 1.0  ;;  %v868_v43 = vld [vmem:[%s2195_s3 + $0x8] sm:$0xff] }
 0x133   : > { %1726 = vrcp.f32 %v710_v23  ;;  %1563 = vmatprep.subr.mxu0 %v875_v34  ;;  %v714_v37 = vmax.f32 %v2016_v32, 1.0  ;;  %1598 = vmatpush3.msra.mxu1 %v870_v33  ;;  %v874_v42 = vld [vmem:[%s2195_s3 + $0x38] sm:$0xff]  ;;  %v873_v44 = vld [vmem:[%s2195_s3 + $0x30] sm:$0xff]  ;;  %v715_v45 = vmax.f32 %v2033_v40, 1.0  ;;  %v867_v48 = vld [vmem:[%s2195_s3] sm:$0xff] }
 0x134   : > { %v2004_v26 = vld [vmem:[#allocation2 + $0x28] sm:$0xff]  ;;  %1728 = vrcp.f32 %v708_v25  ;;  %1564 = vmatpush3.msra.mxu0 %v875_v34  ;;  %1599 = vmatprep.subr.mxu1 %v869_v36  ;;  %v2046_v46 = vld [vmem:[#allocation2 + $0x58] sm:$0xff]  ;;  %v2048_v47 = vld [vmem:[#allocation2 + $0x50] sm:$0xff] }
 0x135   : > { %v712_v28 = vmax.f32 %v2004_v26, 1.0  ;;  %1600 = vmatpush3.msra.mxu1 %v869_v36  ;;  %1565 = vmatprep.subr.mxu0 %v874_v42  ;;  %v851_v50 = vld [vmem:[%s1933_s12] sm:$0xff]  ;;  %v718_v52 = vmax.f32 %v2046_v46, 1.0  ;;  %v872_v53 = vld [vmem:[%s2195_s3 + $0x28] sm:$0xff]  ;;  %v717_v56 = vmax.f32 %v2048_v47, 1.0  ;;  %v853_v60 = vld [vmem:[%s1933_s12 + $0x10] sm:$0xff] }
 0x136   : > { %1601 = vmatprep.subr.mxu1 %v868_v43  ;;  %1566 = vmatpush3.msra.mxu0 %v874_v42  ;;  %v852_v54 = vld [vmem:[%s1933_s12 + $0x8] sm:$0xff]  ;;  %v2062_v59 = vld [vmem:[#allocation2 + $0x60] sm:$0xff]  ;;  %v854_v62 = vld [vmem:[%s1933_s12 + $0x18] sm:$0xff] }
 0x137   : > { %1730 = vrcp.f32 %v712_v28  ;;  %1602 = vmatpush3.msra.mxu1 %v868_v43  ;;  %1567 = vmatprep.subr.mxu0 %v873_v44  ;;  %v2060_v57 = vld [vmem:[#allocation2 + $0x68] sm:$0xff]  ;;  %v719_v0 = vmax.f32 %v2062_v59, 1.0  ;;  %v2071_v1 = vld [vmem:[#allocation2 + $0x78] sm:$0xff]  ;;  %v2073_v3 = vld [vmem:[#allocation2 + $0x70] sm:$0xff] }
 0x138   : > { %1732 = vrcp.f32 %v711_v31  ;;  %1603 = vmatprep.subr.mxu1 %v867_v48  ;;  %1568 = vmatpush3.msra.mxu0 %v873_v44  ;;  %v720_v61 = vmax.f32 %v2060_v57, 1.0  ;;  %v855_v4 = vld [vmem:[%s1933_s12 + $0x20] sm:$0xff]  ;;  %v722_v5 = vmax.f32 %v2071_v1, 1.0  ;;  %v856_v6 = vld [vmem:[%s1933_s12 + $0x28] sm:$0xff]  ;;  %v721_v8 = vmax.f32 %v2073_v3, 1.0  ;;  %v857_v10 = vld [vmem:[%s1933_s12 + $0x30] sm:$0xff] }
 0x139   : > { %1734 = vrcp.f32 %v714_v37  ;;  %1604 = vmatpush3.msra.mxu1 %v867_v48  ;;  %1605 = vmatprep.mubr.msk.f32.mxu1 %vm670_vm1, %v851_v50  ;;  %v858_v11 = vld [vmem:[%s1933_s12 + $0x38] sm:$0xff]  ;;  %v859_v14 = vld [vmem:[%s1933_s12 + $0x40] sm:$0xff]  ;;  %v860_v15 = vld [vmem:[%s1933_s12 + $0x48] sm:$0xff] }
 0x13a   : > { %1736 = vrcp.f32 %v713_v38  ;;  %1569 = vmatprep.subr.mxu0 %v872_v53  ;;  %1606 = vmatmul.mubr.msk.f32.vlgmr.msra.gmra.mxu1 %vm670_vm1, %v852_v54  ;;  %v861_v21 = vld [vmem:[%s1933_s12 + $0x50] sm:$0xff]  ;;  %v862_v22 = vld [vmem:[%s1933_s12 + $0x58] sm:$0xff]  ;;  %v863_v28 = vld [vmem:[%s1933_s12 + $0x60] sm:$0xff] }
 0x13b   : > { %1738 = vrcp.f32 %v716_v41  ;;  %1570 = vmatpush3.msra.mxu0 %v872_v53  ;;  %1608 = vmatprep.mubr.msk.f32.mxu1 %vm670_vm1, %v853_v60  ;;  %v864_v29 = vld [vmem:[%s1933_s12 + $0x68] sm:$0xff]  ;;  %v865_v33 = vld [vmem:[%s1933_s12 + $0x70] sm:$0xff]  ;;  %v866_v34 = vld [vmem:[%s1933_s12 + $0x78] sm:$0xff] }
 0x13c   : > { %1740 = vrcp.f32 %v715_v45 }
 0x13d   : > { %1742 = vrcp.f32 %v718_v52 }
 0x13e   : > { %v1723_v49 = vpop.eup %1722  ;;  %1744 = vrcp.f32 %v717_v56  ;;  %1609 = vmatmul.mubr.msk.f32.gmra.mxu1 %vm670_vm1, %v854_v62 }
 0x13f   : > { %v1725_v51 = vpop.eup %1724  ;;  %767 = vperm.xlu1 %1721, %v1723_v49   ;;  %1746 = vrcp.f32 %v720_v61  ;;  %1611 = vmatprep.mubr.msk.f32.mxu1 %vm670_vm1, %v855_v4 }
 0x140   : > { %v1727_v55 = vpop.eup %1726  ;;  %757 = vperm.xlu0 %1720, %v1725_v51   ;;  %1748 = vrcp.f32 %v719_v0 }
 0x141   : > { %v1729_v58 = vpop.eup %1728  ;;  %1750 = vrcp.f32 %v722_v5 }
 0x142   : > { %1612 = vmatmul.mubr.msk.f32.gmra.mxu1 %vm670_vm1, %v856_v6  ;;  %1752 = vrcp.f32 %v721_v8  ;;  %v2137_v6 = vld [vmem:[%s2196_s4] ss:$0 sm:$0xff] }
 0x143   : > { %772 = vperm.xlu1 %1721, %v1727_v55   ;;  %1614 = vmatprep.mubr.msk.f32.mxu1 %vm670_vm1, %v857_v10 }
 0x144   : > { %v1731_v63 = vpop.eup %1730  ;;  %762 = vperm.xlu0 %1720, %v1729_v58  }
 0x145   : > { %v1733_v2 = vpop.eup %1732 }
 0x146   : > { %v1735_v7 = vpop.eup %1734  ;;  %1615 = vmatmul.mubr.msk.f32.gmra.mxu1 %vm670_vm1, %v858_v11 }
 0x147   : > { %782 = vperm.xlu1 %1721, %v1731_v63   ;;  %v1737_v9 = vpop.eup %1736  ;;  %1617 = vmatprep.mubr.msk.f32.mxu1 %vm670_vm1, %v859_v14 }
 0x148   : > { %777 = vperm.xlu0 %1720, %v1733_v2   ;;  %v1739_v12 = vpop.eup %1738 }
 0x149   : > { %v1741_v13 = vpop.eup %1740 }
 0x14a   : > { %v1743_v16 = vpop.eup %1742  ;;  %1618 = vmatmul.mubr.msk.f32.gmra.mxu1 %vm670_vm1, %v860_v15 }
 0x14b   : > { %792 = vperm.xlu1 %1721, %v1735_v7   ;;  %v1745_v20 = vpop.eup %1744  ;;  %1620 = vmatprep.mubr.msk.f32.mxu1 %vm670_vm1, %v861_v21 }
 0x14c   : > { %787 = vperm.xlu0 %1720, %v1737_v9   ;;  %v1747_v23 = vpop.eup %1746 }
 0x14d   : > { %v1749_v25 = vpop.eup %1748 }
 0x14e   : > { %1621 = vmatmul.mubr.msk.f32.gmra.mxu1 %vm670_vm1, %v862_v22  ;;  %v1751_v30 = vpop.eup %1750 }
 0x14f   : > { %802 = vperm.xlu1 %1721, %v1739_v12   ;;  %1623 = vmatprep.mubr.msk.f32.mxu1 %vm670_vm1, %v863_v28  ;;  %v1753_v31 = vpop.eup %1752 }
 0x150   : > { %797 = vperm.xlu0 %1720, %v1741_v13  }
 0x152   : > { %1624 = vmatmul.mubr.msk.f32.gmra.mxu1 %vm670_vm1, %v864_v29 }
 0x153   : > { %812 = vperm.xlu1 %1721, %v1743_v16   ;;  %1626 = vmatprep.mubr.msk.f32.mxu1 %vm670_vm1, %v865_v33 }
 0x154   : > { %807 = vperm.xlu0 %1720, %v1745_v20  }
 0x156   : > { %1627 = vmatmul.mubr.msk.f32.gmra.mxu1 %vm670_vm1, %v866_v34 }
 0x157   : > { %822 = vperm.xlu1 %1721, %v1747_v23  }
 0x158   : > { %817 = vperm.xlu0 %1720, %v1749_v25  }
 0x15b   : > { %832 = vperm.xlu1 %1721, %v1751_v30  }
 0x15c   : > { %827 = vperm.xlu0 %1720, %v1753_v31  }
 0x1ba   : > { %v768_v36 = vpop.permute.xlu1 %767 }
 0x1bb   : > { %v758_v37 = vpop.permute.xlu0 %757  ;;  %v837_v42 = vmul.f32 %v768_v36, %v1992_v17 }
 0x1bc   : > { %v835_v38 = vmul.f32 %v758_v37, %v1994_v18 }
 0x1be   : > { %1571 = vmatprep.mubr.msk.f32.mxu0 %vm670_vm1, %v835_v38  ;;  %v773_v41 = vpop.permute.xlu1 %772 }
 0x1bf   : > { %v763_v43 = vpop.permute.xlu0 %762  ;;  %v838_v49 = vmul.f32 %v773_v41, %v1996_v19 }
 0x1c0   : > { %v836_v44 = vmul.f32 %v763_v43, %v2001_v24 }
 0x1c2   : > { %1572 = vmatmul.mubr.msk.f32.vlgmr.msra.gmra.mxu0 %vm670_vm1, %v836_v44  ;;  %v783_v45 = vpop.permute.xlu1 %782 }
 0x1c3   : > { %1574 = vmatprep.mubr.msk.f32.mxu0 %vm670_vm1, %v837_v42  ;;  %v778_v48 = vpop.permute.xlu0 %777  ;;  %v840_v17 = vmul.f32 %v783_v45, %v2004_v26 }
 0x1c4   : > { %v839_v50 = vmul.f32 %v778_v48, %v2006_v27 }
 0x1c6   : > { %1575 = vmatmul.mubr.msk.f32.gmra.mxu0 %vm670_vm1, %v838_v49  ;;  %v793_v18 = vpop.permute.xlu1 %792 }
 0x1c7   : > { %1577 = vmatprep.mubr.msk.f32.mxu0 %vm670_vm1, %v839_v50  ;;  %v788_v51 = vpop.permute.xlu0 %787  ;;  %v842_v19 = vmul.f32 %v793_v18, %v2016_v32 }
 0x1c8   : > { %v841_v24 = vmul.f32 %v788_v51, %v2024_v35 }
 0x1ca   : > { %1578 = vmatmul.mubr.msk.f32.gmra.mxu0 %vm670_vm1, %v840_v17  ;;  %v803_v52 = vpop.permute.xlu1 %802 }
 0x1cb   : > { %1580 = vmatprep.mubr.msk.f32.mxu0 %vm670_vm1, %v841_v24  ;;  %v798_v53 = vpop.permute.xlu0 %797  ;;  %v844_v26 = vmul.f32 %v803_v52, %v2031_v39 }
 0x1cc   : > { %v843_v27 = vmul.f32 %v798_v53, %v2033_v40 }
 0x1ce   : > { %1581 = vmatmul.mubr.msk.f32.gmra.mxu0 %vm670_vm1, %v842_v19  ;;  %v813_v54 = vpop.permute.xlu1 %812 }
 0x1cf   : > { %1583 = vmatprep.mubr.msk.f32.mxu0 %vm670_vm1, %v843_v27  ;;  %v808_v55 = vpop.permute.xlu0 %807  ;;  %v846_v32 = vmul.f32 %v813_v54, %v2046_v46 }
 0x1d0   : > { %v845_v35 = vmul.f32 %v808_v55, %v2048_v47 }
 0x1d2   : > { %1584 = vmatmul.mubr.msk.f32.gmra.mxu0 %vm670_vm1, %v844_v26  ;;  %v823_v56 = vpop.permute.xlu1 %822 }
 0x1d3   : > { %1586 = vmatprep.mubr.msk.f32.mxu0 %vm670_vm1, %v845_v35  ;;  %v818_v58 = vpop.permute.xlu0 %817  ;;  %v848_v61 = vmul.f32 %v823_v56, %v2060_v57 }
 0x1d4   : > { %v847_v40 = vmul.f32 %v818_v58, %v2062_v59 }
 0x1d6   : > { %1587 = vmatmul.mubr.msk.f32.gmra.mxu0 %vm670_vm1, %v846_v32  ;;  %v833_v47 = vpop.permute.xlu1 %832 }
 0x1d7   : > { %1589 = vmatprep.mubr.msk.f32.mxu0 %vm670_vm1, %v847_v40  ;;  %v828_v60 = vpop.permute.xlu0 %827  ;;  %v850_v62 = vmul.f32 %v833_v47, %v2071_v1 }
 0x1d8   : > { %v849_v39 = vmul.f32 %v828_v60, %v2073_v3 }
 0x1da   : > { %1590 = vmatmul.mubr.msk.f32.gmra.mxu0 %vm670_vm1, %v848_v61 }
 0x1db   : > { %1592 = vmatprep.mubr.msk.f32.mxu0 %vm670_vm1, %v849_v39 }
 0x1de   : > { %1593 = vmatmul.mubr.msk.f32.gmra.mxu0 %vm670_vm1, %v850_v62 }
 0x1fa   : > { %v1607_v46 = vpop.f32.mrf.mxu1 }
 0x1fc   : > { %v1184_v59 = vpop.f32.mrf.mxu1 }
 0x1fe   : > { %v1610_v63 = vpop.f32.mrf.mxu1 }
 0x200   : > { %v1194_v0 = vpop.f32.mrf.mxu1 }
 0x202   : > { %v1613_v2 = vpop.f32.mrf.mxu1 }
 0x204   : > { %v1204_v4 = vpop.f32.mrf.mxu1 }
 0x206   : > { %v1616_v57 = vpop.f32.mrf.mxu1 }
 0x208   : > { %v1214_v5 = vpop.f32.mrf.mxu1 }
 0x20a   : > { %v1619_v8 = vpop.f32.mrf.mxu1 }
 0x20c   : > { %v1224_v15 = vpop.f32.mrf.mxu1 }
 0x20e   : > { %v1622_v28 = vpop.f32.mrf.mxu1 }
 0x210   : > { %v1234_v37 = vpop.f32.mrf.mxu1 }
 0x212   : > { %v1625_v48 = vpop.f32.mrf.mxu1 }
 0x214   : > { %v1244_v52 = vpop.f32.mrf.mxu1 }
 0x216   : > { %v1628_v35 = vpop.f32.mrf.mxu1 }
 0x218   : > { %v1254_v61 = vpop.f32.mrf.mxu1 }
 0x282   : > { %v1573_v3 = vpop.f32.mrf.mxu0 }
 0x283   : > { %v1190_v1 = vadd.f32 %v1607_v46, %v1573_v3 }
 0x284   : > { %v991_v7 = vpop.f32.mrf.mxu0 }
 0x285   : > { %v1271_v9 = vadd.f32 %v2137_v6, %v1190_v1  ;;  %v1185_v10 = vadd.f32 %v1184_v59, %v991_v7 }
 0x286   : > { %v1576_v11 = vpop.f32.mrf.mxu0 }
 0x287   : > { %1287 = vst [vmem:[%s1938_s14 + $0x8] sm:$0xff] %v1271_v9  ;;  %v1270_v12 = vadd.f32 %v2137_v6, %v1185_v10  ;;  %v1200_v13 = vadd.f32 %v1610_v63, %v1576_v11 }
 0x288   : > { %v1001_v14 = vpop.f32.mrf.mxu0 }
 0x289   : > { %1286 = vst [vmem:[%s1938_s14] sm:$0xff] %v1270_v12  ;;  %v1273_v16 = vadd.f32 %v2137_v6, %v1200_v13  ;;  %v1195_v20 = vadd.f32 %v1194_v0, %v1001_v14 }
 0x28a   : > { %v1579_v21 = vpop.f32.mrf.mxu0 }
 0x28b   : > { %1289 = vst [vmem:[%s1938_s14 + $0x18] sm:$0xff] %v1273_v16  ;;  %v1272_v22 = vadd.f32 %v2137_v6, %v1195_v20  ;;  %v1210_v23 = vadd.f32 %v1613_v2, %v1579_v21 }
 0x28c   : > { %v1011_v25 = vpop.f32.mrf.mxu0 }
 0x28d   : > { %1288 = vst [vmem:[%s1938_s14 + $0x10] sm:$0xff] %v1272_v22  ;;  %v1275_v29 = vadd.f32 %v2137_v6, %v1210_v23  ;;  %v1205_v30 = vadd.f32 %v1204_v4, %v1011_v25 }
 0x28e   : > { %v1582_v31 = vpop.f32.mrf.mxu0 }
 0x28f   : > { %1291 = vst [vmem:[%s1938_s14 + $0x28] sm:$0xff] %v1275_v29  ;;  %v1274_v33 = vadd.f32 %v2137_v6, %v1205_v30  ;;  %v1220_v34 = vadd.f32 %v1616_v57, %v1582_v31 }
 0x290   : > { %v1021_v36 = vpop.f32.mrf.mxu0 }
 0x291   : > { %1290 = vst [vmem:[%s1938_s14 + $0x20] sm:$0xff] %v1274_v33  ;;  %v1277_v38 = vadd.f32 %v2137_v6, %v1220_v34  ;;  %v1215_v41 = vadd.f32 %v1214_v5, %v1021_v36 }
 0x292   : > { %v1585_v42 = vpop.f32.mrf.mxu0 }
 0x293   : > { %1293 = vst [vmem:[%s1938_s14 + $0x38] sm:$0xff] %v1277_v38  ;;  %v1276_v43 = vadd.f32 %v2137_v6, %v1215_v41  ;;  %v1230_v44 = vadd.f32 %v1619_v8, %v1585_v42 }
 0x294   : > { %v1031_v45 = vpop.f32.mrf.mxu0 }
 0x295   : > { %1292 = vst [vmem:[%s1938_s14 + $0x30] sm:$0xff] %v1276_v43  ;;  %v1279_v49 = vadd.f32 %v2137_v6, %v1230_v44  ;;  %v1225_v50 = vadd.f32 %v1224_v15, %v1031_v45 }
 0x296   : > { %v1588_v18 = vpop.f32.mrf.mxu0 }
 0x297   : > { %1295 = vst [vmem:[%s1938_s14 + $0x48] sm:$0xff] %v1279_v49  ;;  %v1278_v51 = vadd.f32 %v2137_v6, %v1225_v50  ;;  %v1240_v17 = vadd.f32 %v1622_v28, %v1588_v18 }
 0x298   : > { %v1041_v24 = vpop.f32.mrf.mxu0 }
 0x299   : > { %1294 = vst [vmem:[%s1938_s14 + $0x40] sm:$0xff] %v1278_v51  ;;  %v1281_v53 = vadd.f32 %v2137_v6, %v1240_v17  ;;  %v1235_v19 = vadd.f32 %v1234_v37, %v1041_v24 }
 0x29a   : > { %v1591_v27 = vpop.f32.mrf.mxu0 }
 0x29b   : > { %1297 = vst [vmem:[%s1938_s14 + $0x58] sm:$0xff] %v1281_v53  ;;  %v1280_v54 = vadd.f32 %v2137_v6, %v1235_v19  ;;  %v1250_v55 = vadd.f32 %v1625_v48, %v1591_v27 }
 0x29c   : > { %v1051_v26 = vpop.f32.mrf.mxu0 }
 0x29d   : > { %1296 = vst [vmem:[%s1938_s14 + $0x50] sm:$0xff] %v1280_v54  ;;  %v1283_v56 = vadd.f32 %v2137_v6, %v1250_v55  ;;  %v1245_v58 = vadd.f32 %v1244_v52, %v1051_v26 }
 0x29e   : > { %v1594_v32 = vpop.f32.mrf.mxu0 }
 0x29f   : > { %1299 = vst [vmem:[%s1938_s14 + $0x68] sm:$0xff] %v1283_v56  ;;  %v1282_v40 = vadd.f32 %v2137_v6, %v1245_v58  ;;  %v1260_v60 = vadd.f32 %v1628_v35, %v1594_v32 }
 0x2a0   : > { %v1061_v39 = vpop.f32.mrf.mxu0 }
 0x2a1   : > { %1298 = vst [vmem:[%s1938_s14 + $0x60] sm:$0xff] %v1282_v40  ;;  %v1285_v47 = vadd.f32 %v2137_v6, %v1260_v60  ;;  %v1255_v62 = vadd.f32 %v1254_v61, %v1061_v39 }
 0x2a3   : > { %1301 = vst [vmem:[%s1938_s14 + $0x78] sm:$0xff] %v1285_v47  ;;  %v1284_v46 = vadd.f32 %v2137_v6, %v1255_v62 }
 0x2a5   : > { %1300 = vst [vmem:[%s1938_s14 + $0x70] sm:$0xff] %v1284_v46 }
 0x2a6 PF: > { %s15_s24 = sadd.s32 1, %s1808_s24   ;;  %s2198_s18 = smov %s1788_s19 }
 0x2a7   : > { %p12_p0 = scmp.ge.s32.totalorder %s15_s24, 11   ;;  %s2199_s19 = smov %s1893_s6 }
 0x2a8   : > { %s2200_s20 = smov %s1800_s22  ;;  %s2201_s21 = smov %s1804_s23 }
 0x2a9   : > { %s2202_s22 = smov %s2205_s25  ;;  %s2203_s23 = smov %s2209_s26 }
 0x2aa   :  { %14 = sbr.rel (!%p12_p0) target bundleno = 4 (0x4), region = 130 }

</bundles_post_ra>
